<compile_context>
chip_gen: v7x
topology: tpu7x:2x2x1
jax: 0.10.0
libtpu: 0.0.40
codegen_flags: <defaults>
</compile_context>

<pallas_src>
import jax
import jax.numpy as jnp
from jax.experimental import pallas as pl
from jax.experimental.pallas import tpu as pltpu

NUM_BLOCKS = 5
IN_FEATURES = 88
HIDDEN_FEATURES = 88
OUT_FEATURES = 5
F_PAD = 128          # lane-padded feature width
TILE_B_MAX = 2048    # batch tile cap (multiple of 8)


def _cdiv(a, b):
    return (a + b - 1) // b


def _round_up(n, m):
    return ((n + m - 1) // m) * m


def _choose_tiling(B):
    """Balanced tiling: pick step count first, then tile size (minimizes padding waste)."""
    n = _cdiv(B, TILE_B_MAX)                 # enough steps to respect the tile cap
    n = max(n, min(2, _cdiv(B, 8)))          # >=2 steps (v7x: 2 TCs) once each gets >=8 real rows
    if n > 1 and n % 2:                      # even step count splits cleanly across 2 TCs
        n += 1
    tile_b = _round_up(_cdiv(B, n), 8)
    return tile_b, n * tile_b


def egemaps_kernel(x_ref, w_in_ref, b_in_ref,
                   w1_ref, b1_ref, w2_ref, b2_ref,
                   w_out_ref, b_out_ref, o_ref):
    x = x_ref[...]                                                    # (TILE_B, 128) bf16

    # input_fc
    h = jnp.dot(x, w_in_ref[...], preferred_element_type=jnp.float32) + b_in_ref[...]

    # 5 residual blocks (statically unrolled; weights resident in VMEM)
    for i in range(NUM_BLOCKS):
        out = jnp.dot(h.astype(jnp.bfloat16), w1_ref[i],
                      preferred_element_type=jnp.float32) + b1_ref[i]
        out = jnp.maximum(out, 0.0)                                   # ReLU
        # Dropout(0.3) -> identity (inference)
        out = jnp.dot(out.astype(jnp.bfloat16), w2_ref[i],
                      preferred_element_type=jnp.float32) + b2_ref[i]
        h = jnp.maximum(out + h, 0.0)                                 # residual add + ReLU

    # output_fc (padded to 128 lanes; wrapper slices [:, :5]); bf16 writeback
    y = jnp.dot(h.astype(jnp.bfloat16), w_out_ref[...],
                preferred_element_type=jnp.float32) + b_out_ref[...]
    o_ref[...] = y.astype(o_ref.dtype)


def prepare_params(params):
    """ONE-TIME: zero-pad feature dims to 128 and cast weights to bf16.

    Call once per model and reuse the result across forward calls (hoisted out of the
    per-call path per the perf review).
    """
    def pad_w(w):   # (in, out) -> (128, 128)
        return jnp.zeros((F_PAD, F_PAD), jnp.float32).at[:w.shape[0], :w.shape[1]].set(w)

    def pad_b(b):   # (1, out) -> (1, 128)
        return jnp.zeros((1, F_PAD), jnp.float32).at[:, :b.shape[1]].set(b)

    w1 = jnp.stack([pad_w(params["w1"][i]) for i in range(NUM_BLOCKS)])
    w2 = jnp.stack([pad_w(params["w2"][i]) for i in range(NUM_BLOCKS)])
    b1 = jnp.stack([pad_b(params["b1"][i]) for i in range(NUM_BLOCKS)])
    b2 = jnp.stack([pad_b(params["b2"][i]) for i in range(NUM_BLOCKS)])

    prepared = {
        "w_in": pad_w(params["w_in"]).astype(jnp.bfloat16),
        "b_in": pad_b(params["b_in"]),
        "w1": w1.astype(jnp.bfloat16), "b1": b1,          # (5,128,128) bf16, (5,1,128) f32
        "w2": w2.astype(jnp.bfloat16), "b2": b2,
        "w_out": pad_w(params["w_out"]).astype(jnp.bfloat16),
        "b_out": pad_b(params["b_out"]),
    }
    # Materialize now so per-call traces see ready-made constants, not a pad/cast graph.
    return jax.tree_util.tree_map(jnp.asarray, prepared)


def egemaps_forward(x, prepared_params):
    """x: (B, 88) float32. prepared_params: output of prepare_params() (padded/bf16)."""
    B = x.shape[0]
    tile_b, b_pad = _choose_tiling(B)

    # Pad batch + feature dims directly in bf16 (no f32 intermediate).
    x_p = jnp.zeros((b_pad, F_PAD), jnp.bfloat16).at[:B, :IN_FEATURES].set(
        x.astype(jnp.bfloat16))

    pp = prepared_params
    operands = (x_p, pp["w_in"], pp["b_in"], pp["w1"], pp["b1"],
                pp["w2"], pp["b2"], pp["w_out"], pp["b_out"])

    def resident(shape):
        nd = len(shape)
        return pl.BlockSpec(shape, lambda i, _nd=nd: (0,) * _nd)   # constant -> stays in VMEM

    in_specs = [pl.BlockSpec((tile_b, F_PAD), lambda i: (i, 0))] + \
               [resident(op.shape) for op in operands[1:]]
    out_spec = pl.BlockSpec((tile_b, F_PAD), lambda i: (i, 0))

    n_matmuls = 2 + 2 * NUM_BLOCKS
    weight_bytes = sum(int(op.size) * op.dtype.itemsize for op in operands[1:])
    cost = pl.CostEstimate(
        flops=2 * b_pad * F_PAD * F_PAD * n_matmuls,
        transcendentals=0,
        bytes_accessed=b_pad * F_PAD * (2 + 2) + weight_bytes,   # bf16 in + bf16 out
    )

    y_pad = pl.pallas_call(
        egemaps_kernel,
        out_shape=jax.ShapeDtypeStruct((b_pad, F_PAD), jnp.bfloat16),
        grid=(pl.cdiv(b_pad, tile_b),),
        in_specs=in_specs,
        out_specs=out_spec,
        compiler_params=pltpu.CompilerParams(dimension_semantics=("parallel",)),
        cost_estimate=cost,
    )(*operands)

    return y_pad[:B, :OUT_FEATURES].astype(jnp.float32)


def init_params(key):
    """Deterministic synthetic parameters with the shapes nn.Linear implies.

    PyTorch Linear weight is (out, in); we store the transpose (in, out) so the
    kernel does x @ W.  Biases are stored as (1, out) rows.
    """
    keys = jax.random.split(key, 3)

    def lin(k, fan_in, fan_out):
        bound = 1.0 / jnp.sqrt(fan_in)
        kw, kb = jax.random.split(k)
        w = jax.random.uniform(kw, (fan_in, fan_out), jnp.float32, -bound, bound)
        b = jax.random.uniform(kb, (1, fan_out), jnp.float32, -bound, bound)
        return w, b

    w_in, b_in = lin(keys[0], IN_FEATURES, HIDDEN_FEATURES)
    w_out, b_out = lin(keys[1], HIDDEN_FEATURES, OUT_FEATURES)

    blk_keys = jax.random.split(keys[2], NUM_BLOCKS)
    w1s, b1s, w2s, b2s = [], [], [], []
    for bk in blk_keys:
        k1, k2 = jax.random.split(bk)
        w1, b1 = lin(k1, HIDDEN_FEATURES, HIDDEN_FEATURES)
        w2, b2 = lin(k2, HIDDEN_FEATURES, HIDDEN_FEATURES)
        w1s.append(w1); b1s.append(b1); w2s.append(w2); b2s.append(b2)

    return {
        "w_in": w_in, "b_in": b_in,
        "w1": jnp.stack(w1s), "b1": jnp.stack(b1s),     # (5, 88, 88), (5, 1, 88)
        "w2": jnp.stack(w2s), "b2": jnp.stack(b2s),
        "w_out": w_out, "b_out": b_out,
    }


def egemaps_reference(x, params):
    """Pure-JAX reference mirroring the kernel: bf16 matmul inputs, f32 accumulation,
    bf16 output writeback."""
    bf = jnp.bfloat16

    def mm(a, w):
        return jnp.dot(a.astype(bf), w.astype(bf), preferred_element_type=jnp.float32)

    h = mm(x, params["w_in"]) + params["b_in"]
    for i in range(NUM_BLOCKS):
        out = jnp.maximum(mm(h, params["w1"][i]) + params["b1"][i], 0.0)
        out = mm(out, params["w2"][i]) + params["b2"][i]
        h = jnp.maximum(out + h, 0.0)
    y = mm(h, params["w_out"]) + params["b_out"]
    return y.astype(bf).astype(jnp.float32)


if __name__ == "__main__":
    key = jax.random.PRNGKey(0)
    kx, kp = jax.random.split(key)

    B = 8
    x = jax.random.normal(kx, (B, IN_FEATURES), dtype=jnp.float32)
    params = init_params(kp)

    prepared = prepare_params(params)                 # one-time, hoisted out of the call path
    fwd = jax.jit(egemaps_forward)

    y = fwd(x, prepared)
    y = jax.block_until_ready(y)

    y_ref = egemaps_reference(x, params)
    assert y.shape == (B, OUT_FEATURES)
    assert jnp.allclose(y, y_ref, atol=1e-2, rtol=1e-2), \
        f"max abs err {jnp.max(jnp.abs(y - y_ref))}"

    print("KERNEL_OK")
</pallas_src>

<mosaic_0001>
module attributes {stable_mosaic.version = 11 : i64} {
  func.func @egemaps_kernel(%arg0: i32, %arg1: memref<8x128xbf16, #tpu.memory_space<vmem>>, %arg2: memref<128x128xbf16, #tpu.memory_space<vmem>>, %arg3: memref<1x128xf32, #tpu.memory_space<vmem>>, %arg4: memref<5x128x128xbf16, #tpu.memory_space<vmem>>, %arg5: memref<5x1x128xf32, #tpu.memory_space<vmem>>, %arg6: memref<5x128x128xbf16, #tpu.memory_space<vmem>>, %arg7: memref<5x1x128xf32, #tpu.memory_space<vmem>>, %arg8: memref<128x128xbf16, #tpu.memory_space<vmem>>, %arg9: memref<1x128xf32, #tpu.memory_space<vmem>>, %arg10: memref<8x128xbf16, #tpu.memory_space<vmem>>) attributes {dimension_semantics = [#tpu.dimension_semantics<parallel>], iteration_bounds = array<i64: 1>, scalar_prefetch = 0 : i64, scratch_operands = 0 : i64, tpu.core_type = #tpu.core_type<tc>, window_params = [{transform_indices = @transform_0, window_bounds = array<i64: 8, 128>}, {pipeline_mode = #tpu.pipeline_mode<synchronous>, transform_indices = @transform_1, window_bounds = array<i64: 128, 128>}, {pipeline_mode = #tpu.pipeline_mode<synchronous>, transform_indices = @transform_2, window_bounds = array<i64: 1, 128>}, {pipeline_mode = #tpu.pipeline_mode<synchronous>, transform_indices = @transform_3, window_bounds = array<i64: 5, 128, 128>}, {pipeline_mode = #tpu.pipeline_mode<synchronous>, transform_indices = @transform_4, window_bounds = array<i64: 5, 1, 128>}, {pipeline_mode = #tpu.pipeline_mode<synchronous>, transform_indices = @transform_5, window_bounds = array<i64: 5, 128, 128>}, {pipeline_mode = #tpu.pipeline_mode<synchronous>, transform_indices = @transform_6, window_bounds = array<i64: 5, 1, 128>}, {pipeline_mode = #tpu.pipeline_mode<synchronous>, transform_indices = @transform_7, window_bounds = array<i64: 128, 128>}, {pipeline_mode = #tpu.pipeline_mode<synchronous>, transform_indices = @transform_8, window_bounds = array<i64: 1, 128>}, {transform_indices = @transform_9, window_bounds = array<i64: 8, 128>}]} {
    %c0 = arith.constant 0 : index
    %c0_0 = arith.constant 0 : index
    %0 = vector.load %arg1[%c0, %c0_0] : memref<8x128xbf16, #tpu.memory_space<vmem>>, vector<8x128xbf16>
    %c0_1 = arith.constant 0 : index
    %c0_2 = arith.constant 0 : index
    %1 = vector.load %arg2[%c0_1, %c0_2] : memref<128x128xbf16, #tpu.memory_space<vmem>>, vector<128x128xbf16>
    %cst = arith.constant dense<0.000000e+00> : vector<8x128xf32>
    %2 = tpu.matmul %0, %1, %cst {dimension_numbers = #tpu.dot_dimension_numbers<[1], [0], [0], [1], [0, 0, 1, 1], [], []>} : vector<8x128xbf16>, vector<128x128xbf16>, vector<8x128xf32> -> vector<8x128xf32>
    %c0_3 = arith.constant 0 : index
    %c0_4 = arith.constant 0 : index
    %3 = vector.load %arg3[%c0_3, %c0_4] : memref<1x128xf32, #tpu.memory_space<vmem>>, vector<1x128xf32>
    %4 = vector.broadcast %3 : vector<1x128xf32> to vector<8x128xf32>
    %5 = arith.addf %2, %4 : vector<8x128xf32>
    %6 = arith.truncf %5 : vector<8x128xf32> to vector<8x128xbf16>
    %c0_5 = arith.constant 0 : index
    %c0_6 = arith.constant 0 : index
    %c0_7 = arith.constant 0 : index
    %7 = vector.load %arg4[%c0_5, %c0_6, %c0_7] : memref<5x128x128xbf16, #tpu.memory_space<vmem>>, vector<1x128x128xbf16>
    %8 = vector.shape_cast %7 : vector<1x128x128xbf16> to vector<128x128xbf16>
    %cst_8 = arith.constant dense<0.000000e+00> : vector<8x128xf32>
    %9 = tpu.matmul %6, %8, %cst_8 {dimension_numbers = #tpu.dot_dimension_numbers<[1], [0], [0], [1], [0, 0, 1, 1], [], []>} : vector<8x128xbf16>, vector<128x128xbf16>, vector<8x128xf32> -> vector<8x128xf32>
    %c0_9 = arith.constant 0 : index
    %c0_10 = arith.constant 0 : index
    %c0_11 = arith.constant 0 : index
    %10 = vector.load %arg5[%c0_9, %c0_10, %c0_11] : memref<5x1x128xf32, #tpu.memory_space<vmem>>, vector<1x1x128xf32>
    %11 = vector.shape_cast %10 : vector<1x1x128xf32> to vector<1x128xf32>
    %12 = vector.broadcast %11 : vector<1x128xf32> to vector<8x128xf32>
    %13 = arith.addf %9, %12 : vector<8x128xf32>
    %cst_12 = arith.constant 0.000000e+00 : f32
    %14 = vector.broadcast %cst_12 : f32 to vector<8x128xf32>
    %15 = arith.maximumf %13, %14 : vector<8x128xf32>
    %16 = arith.truncf %15 : vector<8x128xf32> to vector<8x128xbf16>
    %c0_13 = arith.constant 0 : index
    %c0_14 = arith.constant 0 : index
    %c0_15 = arith.constant 0 : index
    %17 = vector.load %arg6[%c0_13, %c0_14, %c0_15] : memref<5x128x128xbf16, #tpu.memory_space<vmem>>, vector<1x128x128xbf16>
    %18 = vector.shape_cast %17 : vector<1x128x128xbf16> to vector<128x128xbf16>
    %cst_16 = arith.constant dense<0.000000e+00> : vector<8x128xf32>
    %19 = tpu.matmul %16, %18, %cst_16 {dimension_numbers = #tpu.dot_dimension_numbers<[1], [0], [0], [1], [0, 0, 1, 1], [], []>} : vector<8x128xbf16>, vector<128x128xbf16>, vector<8x128xf32> -> vector<8x128xf32>
    %c0_17 = arith.constant 0 : index
    %c0_18 = arith.constant 0 : index
    %c0_19 = arith.constant 0 : index
    %20 = vector.load %arg7[%c0_17, %c0_18, %c0_19] : memref<5x1x128xf32, #tpu.memory_space<vmem>>, vector<1x1x128xf32>
    %21 = vector.shape_cast %20 : vector<1x1x128xf32> to vector<1x128xf32>
    %22 = vector.broadcast %21 : vector<1x128xf32> to vector<8x128xf32>
    %23 = arith.addf %19, %22 : vector<8x128xf32>
    %24 = arith.addf %23, %5 : vector<8x128xf32>
    %cst_20 = arith.constant 0.000000e+00 : f32
    %25 = vector.broadcast %cst_20 : f32 to vector<8x128xf32>
    %26 = arith.maximumf %24, %25 : vector<8x128xf32>
    %27 = arith.truncf %26 : vector<8x128xf32> to vector<8x128xbf16>
    %c1 = arith.constant 1 : index
    %c0_21 = arith.constant 0 : index
    %c0_22 = arith.constant 0 : index
    %28 = vector.load %arg4[%c1, %c0_21, %c0_22] : memref<5x128x128xbf16, #tpu.memory_space<vmem>>, vector<1x128x128xbf16>
    %29 = vector.shape_cast %28 : vector<1x128x128xbf16> to vector<128x128xbf16>
    %cst_23 = arith.constant dense<0.000000e+00> : vector<8x128xf32>
    %30 = tpu.matmul %27, %29, %cst_23 {dimension_numbers = #tpu.dot_dimension_numbers<[1], [0], [0], [1], [0, 0, 1, 1], [], []>} : vector<8x128xbf16>, vector<128x128xbf16>, vector<8x128xf32> -> vector<8x128xf32>
    %c1_24 = arith.constant 1 : index
    %c0_25 = arith.constant 0 : index
    %c0_26 = arith.constant 0 : index
    %31 = vector.load %arg5[%c1_24, %c0_25, %c0_26] : memref<5x1x128xf32, #tpu.memory_space<vmem>>, vector<1x1x128xf32>
    %32 = vector.shape_cast %31 : vector<1x1x128xf32> to vector<1x128xf32>
    %33 = vector.broadcast %32 : vector<1x128xf32> to vector<8x128xf32>
    %34 = arith.addf %30, %33 : vector<8x128xf32>
    %cst_27 = arith.constant 0.000000e+00 : f32
    %35 = vector.broadcast %cst_27 : f32 to vector<8x128xf32>
    %36 = arith.maximumf %34, %35 : vector<8x128xf32>
    %37 = arith.truncf %36 : vector<8x128xf32> to vector<8x128xbf16>
    %c1_28 = arith.constant 1 : index
    %c0_29 = arith.constant 0 : index
    %c0_30 = arith.constant 0 : index
    %38 = vector.load %arg6[%c1_28, %c0_29, %c0_30] : memref<5x128x128xbf16, #tpu.memory_space<vmem>>, vector<1x128x128xbf16>
    %39 = vector.shape_cast %38 : vector<1x128x128xbf16> to vector<128x128xbf16>
    %cst_31 = arith.constant dense<0.000000e+00> : vector<8x128xf32>
    %40 = tpu.matmul %37, %39, %cst_31 {dimension_numbers = #tpu.dot_dimension_numbers<[1], [0], [0], [1], [0, 0, 1, 1], [], []>} : vector<8x128xbf16>, vector<128x128xbf16>, vector<8x128xf32> -> vector<8x128xf32>
    %c1_32 = arith.constant 1 : index
    %c0_33 = arith.constant 0 : index
    %c0_34 = arith.constant 0 : index
    %41 = vector.load %arg7[%c1_32, %c0_33, %c0_34] : memref<5x1x128xf32, #tpu.memory_space<vmem>>, vector<1x1x128xf32>
    %42 = vector.shape_cast %41 : vector<1x1x128xf32> to vector<1x128xf32>
    %43 = vector.broadcast %42 : vector<1x128xf32> to vector<8x128xf32>
    %44 = arith.addf %40, %43 : vector<8x128xf32>
    %45 = arith.addf %44, %26 : vector<8x128xf32>
    %cst_35 = arith.constant 0.000000e+00 : f32
    %46 = vector.broadcast %cst_35 : f32 to vector<8x128xf32>
    %47 = arith.maximumf %45, %46 : vector<8x128xf32>
    %48 = arith.truncf %47 : vector<8x128xf32> to vector<8x128xbf16>
    %c2 = arith.constant 2 : index
    %c0_36 = arith.constant 0 : index
    %c0_37 = arith.constant 0 : index
    %49 = vector.load %arg4[%c2, %c0_36, %c0_37] : memref<5x128x128xbf16, #tpu.memory_space<vmem>>, vector<1x128x128xbf16>
    %50 = vector.shape_cast %49 : vector<1x128x128xbf16> to vector<128x128xbf16>
    %cst_38 = arith.constant dense<0.000000e+00> : vector<8x128xf32>
    %51 = tpu.matmul %48, %50, %cst_38 {dimension_numbers = #tpu.dot_dimension_numbers<[1], [0], [0], [1], [0, 0, 1, 1], [], []>} : vector<8x128xbf16>, vector<128x128xbf16>, vector<8x128xf32> -> vector<8x128xf32>
    %c2_39 = arith.constant 2 : index
    %c0_40 = arith.constant 0 : index
    %c0_41 = arith.constant 0 : index
    %52 = vector.load %arg5[%c2_39, %c0_40, %c0_41] : memref<5x1x128xf32, #tpu.memory_space<vmem>>, vector<1x1x128xf32>
    %53 = vector.shape_cast %52 : vector<1x1x128xf32> to vector<1x128xf32>
    %54 = vector.broadcast %53 : vector<1x128xf32> to vector<8x128xf32>
    %55 = arith.addf %51, %54 : vector<8x128xf32>
    %cst_42 = arith.constant 0.000000e+00 : f32
    %56 = vector.broadcast %cst_42 : f32 to vector<8x128xf32>
    %57 = arith.maximumf %55, %56 : vector<8x128xf32>
    %58 = arith.truncf %57 : vector<8x128xf32> to vector<8x128xbf16>
    %c2_43 = arith.constant 2 : index
    %c0_44 = arith.constant 0 : index
    %c0_45 = arith.constant 0 : index
    %59 = vector.load %arg6[%c2_43, %c0_44, %c0_45] : memref<5x128x128xbf16, #tpu.memory_space<vmem>>, vector<1x128x128xbf16>
    %60 = vector.shape_cast %59 : vector<1x128x128xbf16> to vector<128x128xbf16>
    %cst_46 = arith.constant dense<0.000000e+00> : vector<8x128xf32>
    %61 = tpu.matmul %58, %60, %cst_46 {dimension_numbers = #tpu.dot_dimension_numbers<[1], [0], [0], [1], [0, 0, 1, 1], [], []>} : vector<8x128xbf16>, vector<128x128xbf16>, vector<8x128xf32> -> vector<8x128xf32>
    %c2_47 = arith.constant 2 : index
    %c0_48 = arith.constant 0 : index
    %c0_49 = arith.constant 0 : index
    %62 = vector.load %arg7[%c2_47, %c0_48, %c0_49] : memref<5x1x128xf32, #tpu.memory_space<vmem>>, vector<1x1x128xf32>
    %63 = vector.shape_cast %62 : vector<1x1x128xf32> to vector<1x128xf32>
    %64 = vector.broadcast %63 : vector<1x128xf32> to vector<8x128xf32>
    %65 = arith.addf %61, %64 : vector<8x128xf32>
    %66 = arith.addf %65, %47 : vector<8x128xf32>
    %cst_50 = arith.constant 0.000000e+00 : f32
    %67 = vector.broadcast %cst_50 : f32 to vector<8x128xf32>
    %68 = arith.maximumf %66, %67 : vector<8x128xf32>
    %69 = arith.truncf %68 : vector<8x128xf32> to vector<8x128xbf16>
    %c3 = arith.constant 3 : index
    %c0_51 = arith.constant 0 : index
    %c0_52 = arith.constant 0 : index
    %70 = vector.load %arg4[%c3, %c0_51, %c0_52] : memref<5x128x128xbf16, #tpu.memory_space<vmem>>, vector<1x128x128xbf16>
    %71 = vector.shape_cast %70 : vector<1x128x128xbf16> to vector<128x128xbf16>
    %cst_53 = arith.constant dense<0.000000e+00> : vector<8x128xf32>
    %72 = tpu.matmul %69, %71, %cst_53 {dimension_numbers = #tpu.dot_dimension_numbers<[1], [0], [0], [1], [0, 0, 1, 1], [], []>} : vector<8x128xbf16>, vector<128x128xbf16>, vector<8x128xf32> -> vector<8x128xf32>
    %c3_54 = arith.constant 3 : index
    %c0_55 = arith.constant 0 : index
    %c0_56 = arith.constant 0 : index
    %73 = vector.load %arg5[%c3_54, %c0_55, %c0_56] : memref<5x1x128xf32, #tpu.memory_space<vmem>>, vector<1x1x128xf32>
    %74 = vector.shape_cast %73 : vector<1x1x128xf32> to vector<1x128xf32>
    %75 = vector.broadcast %74 : vector<1x128xf32> to vector<8x128xf32>
    %76 = arith.addf %72, %75 : vector<8x128xf32>
    %cst_57 = arith.constant 0.000000e+00 : f32
    %77 = vector.broadcast %cst_57 : f32 to vector<8x128xf32>
    %78 = arith.maximumf %76, %77 : vector<8x128xf32>
    %79 = arith.truncf %78 : vector<8x128xf32> to vector<8x128xbf16>
    %c3_58 = arith.constant 3 : index
    %c0_59 = arith.constant 0 : index
    %c0_60 = arith.constant 0 : index
    %80 = vector.load %arg6[%c3_58, %c0_59, %c0_60] : memref<5x128x128xbf16, #tpu.memory_space<vmem>>, vector<1x128x128xbf16>
    %81 = vector.shape_cast %80 : vector<1x128x128xbf16> to vector<128x128xbf16>
    %cst_61 = arith.constant dense<0.000000e+00> : vector<8x128xf32>
    %82 = tpu.matmul %79, %81, %cst_61 {dimension_numbers = #tpu.dot_dimension_numbers<[1], [0], [0], [1], [0, 0, 1, 1], [], []>} : vector<8x128xbf16>, vector<128x128xbf16>, vector<8x128xf32> -> vector<8x128xf32>
    %c3_62 = arith.constant 3 : index
    %c0_63 = arith.constant 0 : index
    %c0_64 = arith.constant 0 : index
    %83 = vector.load %arg7[%c3_62, %c0_63, %c0_64] : memref<5x1x128xf32, #tpu.memory_space<vmem>>, vector<1x1x128xf32>
    %84 = vector.shape_cast %83 : vector<1x1x128xf32> to vector<1x128xf32>
    %85 = vector.broadcast %84 : vector<1x128xf32> to vector<8x128xf32>
    %86 = arith.addf %82, %85 : vector<8x128xf32>
    %87 = arith.addf %86, %68 : vector<8x128xf32>
    %cst_65 = arith.constant 0.000000e+00 : f32
    %88 = vector.broadcast %cst_65 : f32 to vector<8x128xf32>
    %89 = arith.maximumf %87, %88 : vector<8x128xf32>
    %90 = arith.truncf %89 : vector<8x128xf32> to vector<8x128xbf16>
    %c4 = arith.constant 4 : index
    %c0_66 = arith.constant 0 : index
    %c0_67 = arith.constant 0 : index
    %91 = vector.load %arg4[%c4, %c0_66, %c0_67] : memref<5x128x128xbf16, #tpu.memory_space<vmem>>, vector<1x128x128xbf16>
    %92 = vector.shape_cast %91 : vector<1x128x128xbf16> to vector<128x128xbf16>
    %cst_68 = arith.constant dense<0.000000e+00> : vector<8x128xf32>
    %93 = tpu.matmul %90, %92, %cst_68 {dimension_numbers = #tpu.dot_dimension_numbers<[1], [0], [0], [1], [0, 0, 1, 1], [], []>} : vector<8x128xbf16>, vector<128x128xbf16>, vector<8x128xf32> -> vector<8x128xf32>
    %c4_69 = arith.constant 4 : index
    %c0_70 = arith.constant 0 : index
    %c0_71 = arith.constant 0 : index
    %94 = vector.load %arg5[%c4_69, %c0_70, %c0_71] : memref<5x1x128xf32, #tpu.memory_space<vmem>>, vector<1x1x128xf32>
    %95 = vector.shape_cast %94 : vector<1x1x128xf32> to vector<1x128xf32>
    %96 = vector.broadcast %95 : vector<1x128xf32> to vector<8x128xf32>
    %97 = arith.addf %93, %96 : vector<8x128xf32>
    %cst_72 = arith.constant 0.000000e+00 : f32
    %98 = vector.broadcast %cst_72 : f32 to vector<8x128xf32>
    %99 = arith.maximumf %97, %98 : vector<8x128xf32>
    %100 = arith.truncf %99 : vector<8x128xf32> to vector<8x128xbf16>
    %c4_73 = arith.constant 4 : index
    %c0_74 = arith.constant 0 : index
    %c0_75 = arith.constant 0 : index
    %101 = vector.load %arg6[%c4_73, %c0_74, %c0_75] : memref<5x128x128xbf16, #tpu.memory_space<vmem>>, vector<1x128x128xbf16>
    %102 = vector.shape_cast %101 : vector<1x128x128xbf16> to vector<128x128xbf16>
    %cst_76 = arith.constant dense<0.000000e+00> : vector<8x128xf32>
    %103 = tpu.matmul %100, %102, %cst_76 {dimension_numbers = #tpu.dot_dimension_numbers<[1], [0], [0], [1], [0, 0, 1, 1], [], []>} : vector<8x128xbf16>, vector<128x128xbf16>, vector<8x128xf32> -> vector<8x128xf32>
    %c4_77 = arith.constant 4 : index
    %c0_78 = arith.constant 0 : index
    %c0_79 = arith.constant 0 : index
    %104 = vector.load %arg7[%c4_77, %c0_78, %c0_79] : memref<5x1x128xf32, #tpu.memory_space<vmem>>, vector<1x1x128xf32>
    %105 = vector.shape_cast %104 : vector<1x1x128xf32> to vector<1x128xf32>
    %106 = vector.broadcast %105 : vector<1x128xf32> to vector<8x128xf32>
    %107 = arith.addf %103, %106 : vector<8x128xf32>
    %108 = arith.addf %107, %89 : vector<8x128xf32>
    %cst_80 = arith.constant 0.000000e+00 : f32
    %109 = vector.broadcast %cst_80 : f32 to vector<8x128xf32>
    %110 = arith.maximumf %108, %109 : vector<8x128xf32>
    %111 = arith.truncf %110 : vector<8x128xf32> to vector<8x128xbf16>
    %c0_81 = arith.constant 0 : index
    %c0_82 = arith.constant 0 : index
    %112 = vector.load %arg8[%c0_81, %c0_82] : memref<128x128xbf16, #tpu.memory_space<vmem>>, vector<128x128xbf16>
    %cst_83 = arith.constant dense<0.000000e+00> : vector<8x128xf32>
    %113 = tpu.matmul %111, %112, %cst_83 {dimension_numbers = #tpu.dot_dimension_numbers<[1], [0], [0], [1], [0, 0, 1, 1], [], []>} : vector<8x128xbf16>, vector<128x128xbf16>, vector<8x128xf32> -> vector<8x128xf32>
    %c0_84 = arith.constant 0 : index
    %c0_85 = arith.constant 0 : index
    %114 = vector.load %arg9[%c0_84, %c0_85] : memref<1x128xf32, #tpu.memory_space<vmem>>, vector<1x128xf32>
    %115 = vector.broadcast %114 : vector<1x128xf32> to vector<8x128xf32>
    %116 = arith.addf %113, %115 : vector<8x128xf32>
    %117 = arith.truncf %116 : vector<8x128xf32> to vector<8x128xbf16>
    %c0_86 = arith.constant 0 : index
    %c0_87 = arith.constant 0 : index
    %118 = vector.load %arg10[%c0_86, %c0_87] : memref<8x128xbf16, #tpu.memory_space<vmem>>, vector<8x128xbf16>
    tpu.vector_store %arg10[%c0_86, %c0_87], %117 {strides = array<i32>} : memref<8x128xbf16, #tpu.memory_space<vmem>>, vector<8x128xbf16>,
    return
  }
  func.func @transform_0(%arg0: i32) -> (i32, i32) {
    %c0_i32 = arith.constant 0 : i32
    %c0_i32_0 = arith.constant 0 : i32
    return %arg0, %c0_i32 : i32, i32
  }
  func.func @transform_1(%arg0: i32) -> (i32, i32) {
    %c0_i32 = arith.constant 0 : i32
    %c0_i32_0 = arith.constant 0 : i32
    %c0_i32_1 = arith.constant 0 : i32
    return %c0_i32, %c0_i32_0 : i32, i32
  }
  func.func @transform_2(%arg0: i32) -> (i32, i32) {
    %c0_i32 = arith.constant 0 : i32
    %c0_i32_0 = arith.constant 0 : i32
    %c0_i32_1 = arith.constant 0 : i32
    return %c0_i32, %c0_i32_0 : i32, i32
  }
  func.func @transform_3(%arg0: i32) -> (i32, i32, i32) {
    %c0_i32 = arith.constant 0 : i32
    %c0_i32_0 = arith.constant 0 : i32
    %c0_i32_1 = arith.constant 0 : i32
    %c0_i32_2 = arith.constant 0 : i32
    return %c0_i32, %c0_i32_0, %c0_i32_1 : i32, i32, i32
  }
  func.func @transform_4(%arg0: i32) -> (i32, i32, i32) {
    %c0_i32 = arith.constant 0 : i32
    %c0_i32_0 = arith.constant 0 : i32
    %c0_i32_1 = arith.constant 0 : i32
    %c0_i32_2 = arith.constant 0 : i32
    return %c0_i32, %c0_i32_0, %c0_i32_1 : i32, i32, i32
  }
  func.func @transform_5(%arg0: i32) -> (i32, i32, i32) {
    %c0_i32 = arith.constant 0 : i32
    %c0_i32_0 = arith.constant 0 : i32
    %c0_i32_1 = arith.constant 0 : i32
    %c0_i32_2 = arith.constant 0 : i32
    return %c0_i32, %c0_i32_0, %c0_i32_1 : i32, i32, i32
  }
  func.func @transform_6(%arg0: i32) -> (i32, i32, i32) {
    %c0_i32 = arith.constant 0 : i32
    %c0_i32_0 = arith.constant 0 : i32
    %c0_i32_1 = arith.constant 0 : i32
    %c0_i32_2 = arith.constant 0 : i32
    return %c0_i32, %c0_i32_0, %c0_i32_1 : i32, i32, i32
  }
  func.func @transform_7(%arg0: i32) -> (i32, i32) {
    %c0_i32 = arith.constant 0 : i32
    %c0_i32_0 = arith.constant 0 : i32
    %c0_i32_1 = arith.constant 0 : i32
    return %c0_i32, %c0_i32_0 : i32, i32
  }
  func.func @transform_8(%arg0: i32) -> (i32, i32) {
    %c0_i32 = arith.constant 0 : i32
    %c0_i32_0 = arith.constant 0 : i32
    %c0_i32_1 = arith.constant 0 : i32
    return %c0_i32, %c0_i32_0 : i32, i32
  }
  func.func @transform_9(%arg0: i32) -> (i32, i32) {
    %c0_i32 = arith.constant 0 : i32
    %c0_i32_0 = arith.constant 0 : i32
    return %arg0, %c0_i32 : i32, i32
  }
}

</mosaic_0001>

<bundles_post_ra>
// kernel: egemaps_forward.1
= control target key start
LH: loop header
LB: loop body
LE: loop exit
PB: predicated region body
PF: predicated region fallthrough
CT: control target
= control target key end

     0   :  { %14 = vsyncpa [#allocation3], 0  ;;  %s2448_s0 = inlined_call_operand.vmem [shape: bf16[8,128], index: 0, kind: input, shape index: {}]   ;;  %s2449_s1 = inlined_call_operand.hbm [shape: bf16[128,128], index: 1, kind: input, shape index: {}]   ;;  %s2450_s2 = inlined_call_operand.vmem [shape: f32[1,128], index: 2, kind: input, shape index: {}]   ;;  %s2451_s3 = inlined_call_operand.hbm [shape: bf16[5,128,128], index: 3, kind: input, shape index: {}]   ;;  %s2452_s4 = inlined_call_operand.vmem [shape: f32[5,1,128], index: 4, kind: input, shape index: {}]   ;;  %s2453_s5 = inlined_call_operand.hbm [shape: bf16[5,128,128], index: 5, kind: input, shape index: {}]   ;;  %s2454_s6 = inlined_call_operand.vmem [shape: f32[5,1,128], index: 6, kind: input, shape index: {}]   ;;  %s2455_s7 = inlined_call_operand.hbm [shape: bf16[128,128], index: 7, kind: input, shape index: {}]   ;;  %s2456_s8 = inlined_call_operand.vmem [shape: f32[1,128], index: 8, kind: input, shape index: {}]   ;;  %s2457_s9 = inlined_call_operand.vmem [shape: bf16[8,128], index: 9, kind: output, shape index: {}]  }
   0x1   :  { %15 = vsyncpa [#allocation5], 0 }
   0x2   :  { %16 = vsyncpa [#allocation8], 0  ;;  %s2134_s30 = smov [#allocation4]   ;;  %s2135_s11 = smov [#allocation2]  }
   0x3   :  { %s38_s10 = sshll.u32 %s2134_s30, 4  ;;  %s24_s12 = sshll.u32 %s2135_s11, 4  ;;  %s39_s10 = int_to_ptr.vmem [resolvable:$true] %s38_s10  ;;  %s2192_s12 = int_to_ptr.vmem [resolvable:$true] %s24_s12 }
   0x4   :  { %s2040_s15 = scalar_lea.hbm %s2451_s3, 5120 }
   0x5   :  { %p2041_p0 = scmp.ne.s32.totalorder %s2451_s3, %s2040_s15  ;;  %p2044_p1 = scmp.lt.u32.totalorder %s2040_s15, %s2451_s3 }
   0x7   :  { %p2046_p2 = pnand %p2044_p1, %p2041_p0 }
   0x9   :  { %2049 = shalt.err (!%p2046_p2)
}
   0xa   :  { %s2050_s20 = scalar_lea.vmem %s39_s10, 5120  ;;  %p2055_p4 = scmp.lt.s32.totalorder %s39_s10, %s39_s10 }
   0xb   :  { %p2051_p3 = scmp.ne.s32.totalorder %s39_s10, %s2050_s20  ;;  %p2056_p5 = scmp.lt.s32.totalorder %s2050_s20, %s2050_s20 }
   0xd   :  { %p2057_p6 = por %p2056_p5, %p2055_p4 }
   0xf   :  { %p2058_p7 = pnand %p2057_p6, %p2051_p3 }
  0x11   :  { %2061 = shalt.err (!%p2058_p7)
}
  0x12   :  { %s2136_s21 = smov 64   ;;  %s2137_s22 = smov 4  }
  0x13   :  { %44 = dma.hbm_to_vmem [thread:$0]  %s2451_s3, 5120, %s39_s10, [#allocation5], %s2136_s21, %s2136_s21, %s2137_s22  }
  0x14   :  { %s2062_s27 = scalar_lea.hbm %s2449_s1, 1024 }
  0x15   :  { %p2063_p8 = scmp.ne.s32.totalorder %s2449_s1, %s2062_s27  ;;  %p2066_p9 = scmp.lt.u32.totalorder %s2062_s27, %s2449_s1 }
  0x17   :  { %p2068_p10 = pnand %p2066_p9, %p2063_p8 }
  0x19   :  { %2071 = shalt.err (!%p2068_p10)
}
  0x1a   :  { %s2072_s13 = scalar_lea.vmem %s2192_s12, 1024  ;;  %p2077_p12 = scmp.lt.s32.totalorder %s2192_s12, %s2192_s12 }
  0x1b   :  { %p2073_p11 = scmp.ne.s32.totalorder %s2192_s12, %s2072_s13  ;;  %p2078_p13 = scmp.lt.s32.totalorder %s2072_s13, %s2072_s13 }
  0x1d   :  { %p2079_p0 = por %p2078_p13, %p2077_p12 }
  0x1f   :  { %p2080_p1 = pnand %p2079_p0, %p2073_p11 }
  0x21   :  { %2083 = shalt.err (!%p2080_p1)
}
  0x22   :  { %30 = dma.hbm_to_vmem [thread:$0]  %s2449_s1, 1024, %s2192_s12, [#allocation3], %s2136_s21, %s2136_s21, %s2137_s22  }
  0x23   :  { %s2138_s14 = smov [#allocation6]   ;;  %s2139_s16 = smov [#allocation7]  }
  0x24   :  { %s52_s15 = sshll.u32 %s2138_s14, 4  ;;  %s66_s17 = sshll.u32 %s2139_s16, 4  ;;  %s53_s15 = int_to_ptr.vmem [resolvable:$true] %s52_s15  ;;  %s2229_s17 = int_to_ptr.vmem [resolvable:$true] %s66_s17 }
  0x25   :  { %s2084_s20 = scalar_lea.hbm %s2453_s5, 5120 }
  0x26   :  { %p2085_p2 = scmp.ne.s32.totalorder %s2453_s5, %s2084_s20  ;;  %p2088_p3 = scmp.lt.u32.totalorder %s2084_s20, %s2453_s5 }
  0x28   :  { %p2090_p4 = pnand %p2088_p3, %p2085_p2 }
  0x2a   :  { %2093 = shalt.err (!%p2090_p4)
}
  0x2b   :  { %s2094_s1 = scalar_lea.vmem %s53_s15, 5120  ;;  %p2099_p6 = scmp.lt.s32.totalorder %s53_s15, %s53_s15 }
  0x2c   :  { %p2095_p5 = scmp.ne.s32.totalorder %s53_s15, %s2094_s1  ;;  %p2100_p7 = scmp.lt.s32.totalorder %s2094_s1, %s2094_s1 }
  0x2e   :  { %p2101_p8 = por %p2100_p7, %p2099_p6 }
  0x30   :  { %p2102_p9 = pnand %p2101_p8, %p2095_p5 }
  0x32   :  { %2105 = shalt.err (!%p2102_p9)
}
  0x33   :  { %58 = dma.hbm_to_vmem [thread:$0]  %s2453_s5, 5120, %s53_s15, [#allocation5], %s2136_s21, %s2136_s21, %s2137_s22  }
  0x34   :  { %s2106_s30 = scalar_lea.hbm %s2455_s7, 1024 }
  0x35   :  { %p2107_p10 = scmp.ne.s32.totalorder %s2455_s7, %s2106_s30  ;;  %p2110_p11 = scmp.lt.u32.totalorder %s2106_s30, %s2455_s7 }
  0x37   :  { %p2112_p12 = pnand %p2110_p11, %p2107_p10 }
  0x39   :  { %2115 = shalt.err (!%p2112_p12)
}
  0x3a   :  { %s2116_s14 = scalar_lea.vmem %s2229_s17, 1024  ;;  %p2121_p0 = scmp.lt.s32.totalorder %s2229_s17, %s2229_s17 }
  0x3b   :  { %p2117_p13 = scmp.ne.s32.totalorder %s2229_s17, %s2116_s14  ;;  %p2122_p1 = scmp.lt.s32.totalorder %s2116_s14, %s2116_s14 }
  0x3d   :  { %p2123_p2 = por %p2122_p1, %p2121_p0 }
  0x3f   :  { %p2124_p3 = pnand %p2123_p2, %p2117_p13 }
  0x41   :  { %2127 = shalt.err (!%p2124_p3)
}
  0x42   :  { %72 = dma.hbm_to_vmem [thread:$0]  %s2455_s7, 1024, %s2229_s17, [#allocation8], %s2136_s21, %s2136_s21, %s2137_s22  }
  0x43   :  { %2128 = dma.done.wait [#allocation3], 1024  }
  0x44   :  { %2129 = vsyncadd [#allocation3], 4294966272 }
  0x45   :  { %2130 = dma.done.wait [#allocation5], 10240  }
  0x46   :  { %2131 = vsyncadd [#allocation5], 4294957056 }
  0x47   :  { %2132 = dma.done.wait [#allocation8], 1024  }
  0x48   :  { %2133 = vsyncadd [#allocation8], 4294966272  ;;  %v2140_v0 = vmov 0.0   ;;  %vm2141_vm0 = vmmov 0   ;;  %v1944_v1 = vld [vmem:[#allocation2] sm:$0xff]   ;;  %v1945_v2 = vld [vmem:[#allocation2 + $0x8] sm:$0xff]  }
  0x49   :  { %1696 = vmatprep.subr.bf16.mxu0 %v2140_v0  ;;  %1712 = vmatprep.mubr.msk.bf16.mxu0 %vm2141_vm0, %v2140_v0  ;;  %v1946_v3 = vld [vmem:[#allocation2 + $0x10] sm:$0xff]   ;;  %v1952_v4 = vld [vmem:[#allocation4] sm:$0xff]   ;;  %v1947_v5 = vld [vmem:[#allocation2 + $0x18] sm:$0xff]  }
  0x4a   :  { %1716 = vmatprep.subr.bf16.mxu1 %v2140_v0  ;;  %1732 = vmatprep.mubr.msk.bf16.mxu1 %vm2141_vm0, %v2140_v0  ;;  %v1953_v6 = vld [vmem:[#allocation4 + $0x8] sm:$0xff]   ;;  %v1948_v7 = vld [vmem:[#allocation2 + $0x20] sm:$0xff]   ;;  %v1954_v8 = vld [vmem:[#allocation4 + $0x10] sm:$0xff]  }
  0x4b   :  { %1697 = vmatpush3.bf16.msra.mxu0 %v1944_v1  ;;  %1717 = vmatpush3.bf16.msra.mxu1 %v1952_v4  ;;  %v1949_v9 = vld [vmem:[#allocation2 + $0x28] sm:$0xff]   ;;  %v1955_v10 = vld [vmem:[#allocation4 + $0x18] sm:$0xff]   ;;  %v1950_v11 = vld [vmem:[#allocation2 + $0x30] sm:$0xff]  }
  0x4c   :  { %1698 = vmatprep.subr.bf16.mxu0 %v2140_v0  ;;  %1718 = vmatprep.subr.bf16.mxu1 %v2140_v0  ;;  %v1956_v12 = vld [vmem:[#allocation4 + $0x20] sm:$0xff]   ;;  %v1951_v13 = vld [vmem:[#allocation2 + $0x38] sm:$0xff]   ;;  %v1957_v14 = vld [vmem:[#allocation4 + $0x28] sm:$0xff]  }
  0x4d   :  { %v88_v15 = vld [vmem:[%s2448_s0] sm:$0xf]  ;;  %v1958_v16 = vld [vmem:[#allocation4 + $0x30] sm:$0xff]   ;;  %v1959_v17 = vld [vmem:[#allocation4 + $0x38] sm:$0xff]  }
  0x4e   :  { %v1960_v18 = vld [vmem:[#allocation6] sm:$0xff]   ;;  %v1961_v19 = vld [vmem:[#allocation6 + $0x8] sm:$0xff]   ;;  %v1962_v20 = vld [vmem:[#allocation6 + $0x10] sm:$0xff]  }
  0x4f   :  { %1699 = vmatpush3.bf16.msra.mxu0 %v1945_v2  ;;  %1719 = vmatpush3.bf16.msra.mxu1 %v1953_v6  ;;  %v1963_v21 = vld [vmem:[#allocation6 + $0x18] sm:$0xff]   ;;  %v1964_v22 = vld [vmem:[#allocation6 + $0x20] sm:$0xff]   ;;  %v1965_v23 = vld [vmem:[#allocation6 + $0x28] sm:$0xff]  }
  0x50   :  { %1700 = vmatprep.subr.bf16.mxu0 %v2140_v0  ;;  %1720 = vmatprep.subr.bf16.mxu1 %v2140_v0  ;;  %v1472_v24 = vld [vmem:[%s2450_s2] ss:$0 sm:$0xff]  ;;  %v1966_v31 = vld [vmem:[#allocation6 + $0x30] sm:$0xff]   ;;  %v1967_v32 = vld [vmem:[#allocation6 + $0x38] sm:$0xff]  }
  0x51   :  { %v1968_v33 = vld [vmem:[#allocation4 + $0x40] sm:$0xff]   ;;  %v1969_v34 = vld [vmem:[#allocation4 + $0x48] sm:$0xff]   ;;  %v1970_v35 = vld [vmem:[#allocation4 + $0x50] sm:$0xff]  }
  0x52   :  { %v1971_v36 = vld [vmem:[#allocation4 + $0x58] sm:$0xff]   ;;  %v1972_v37 = vld [vmem:[#allocation4 + $0x60] sm:$0xff]   ;;  %v1973_v38 = vld [vmem:[#allocation4 + $0x68] sm:$0xff]  }
  0x53   :  { %1701 = vmatpush3.bf16.msra.mxu0 %v1946_v3  ;;  %1721 = vmatpush3.bf16.msra.mxu1 %v1954_v8  ;;  %v1481_v39 = vld [vmem:[%s2452_s4] ss:$0 sm:$0xff]  ;;  %v1974_v47 = vld [vmem:[#allocation4 + $0x70] sm:$0xff]   ;;  %v1975_v48 = vld [vmem:[#allocation4 + $0x78] sm:$0xff]  }
  0x54   :  { %1702 = vmatprep.subr.bf16.mxu0 %v2140_v0  ;;  %1722 = vmatprep.subr.bf16.mxu1 %v2140_v0  ;;  %v1976_v49 = vld [vmem:[#allocation6 + $0x40] sm:$0xff]   ;;  %v1977_v50 = vld [vmem:[#allocation6 + $0x48] sm:$0xff]   ;;  %v1978_v51 = vld [vmem:[#allocation6 + $0x50] sm:$0xff]  }
  0x55   :  { %v1979_v52 = vld [vmem:[#allocation6 + $0x58] sm:$0xff]   ;;  %v1980_v53 = vld [vmem:[#allocation6 + $0x60] sm:$0xff]   ;;  %v1981_v54 = vld [vmem:[#allocation6 + $0x68] sm:$0xff]  }
  0x56   :  { %v1490_v55 = vld [vmem:[%s2454_s6] ss:$0 sm:$0xff]  ;;  %v1982_v1 = vld [vmem:[#allocation6 + $0x70] sm:$0xff]   ;;  %v1983_v2 = vld [vmem:[#allocation6 + $0x78] sm:$0xff]  }
  0x57   :  { %1703 = vmatpush3.bf16.msra.mxu0 %v1947_v5  ;;  %1723 = vmatpush3.bf16.msra.mxu1 %v1955_v10  ;;  %v1984_v3 = vld [vmem:[#allocation4 + $0x80] sm:$0xff]   ;;  %v1985_v4 = vld [vmem:[#allocation4 + $0x88] sm:$0xff]   ;;  %v1986_v5 = vld [vmem:[#allocation4 + $0x90] sm:$0xff]  }
  0x58   :  { %1704 = vmatprep.subr.bf16.mxu0 %v2140_v0  ;;  %1724 = vmatprep.subr.bf16.mxu1 %v2140_v0  ;;  %v1987_v6 = vld [vmem:[#allocation4 + $0x98] sm:$0xff]   ;;  %v1989_v8 = vld [vmem:[#allocation4 + $0xa8] sm:$0xff]  }
  0x5b   :  { %1705 = vmatpush3.bf16.msra.mxu0 %v1948_v7  ;;  %1725 = vmatpush3.bf16.msra.mxu1 %v1956_v12  ;;  %v1988_v7 = vld [vmem:[#allocation4 + $0xa0] sm:$0xff]  }
  0x5c   :  { %1706 = vmatprep.subr.bf16.mxu0 %v2140_v0  ;;  %1726 = vmatprep.subr.bf16.mxu1 %v2140_v0 }
  0x5f   :  { %1707 = vmatpush3.bf16.msra.mxu0 %v1949_v9  ;;  %1727 = vmatpush3.bf16.msra.mxu1 %v1957_v14  ;;  %v1500_v9 = vld [vmem:[%s2452_s4 + $0x1] ss:$0 sm:$0xff] }
  0x60   :  { %1708 = vmatprep.subr.bf16.mxu0 %v2140_v0  ;;  %1728 = vmatprep.subr.bf16.mxu1 %v2140_v0 }
  0x63   :  { %1709 = vmatpush3.bf16.msra.mxu0 %v1950_v11  ;;  %1729 = vmatpush3.bf16.msra.mxu1 %v1958_v16 }
  0x64   :  { %1710 = vmatprep.subr.bf16.mxu0 %v2140_v0  ;;  %1730 = vmatprep.subr.bf16.mxu1 %v2140_v0 }
  0x67   :  { %1711 = vmatpush3.bf16.msra.mxu0 %v1951_v13  ;;  %1731 = vmatpush3.bf16.msra.mxu1 %v1959_v17  ;;  %v1990_v17 = vld [vmem:[#allocation4 + $0xb0] sm:$0xff]  }
  0x68   :  { %1736 = vmatprep.subr.bf16.mxu0 %v2140_v0  ;;  %1756 = vmatprep.subr.bf16.mxu1 %v2140_v0 }
  0x6a   :  { %1713 = vmatmul.mubr.bf16.vlgmr.msra.gmra.mrb[0].mxu0 %v88_v15 }
  0x6b   :  { %1752 = vmatprep.mubr.msk.bf16.mxu0 %vm2141_vm0, %v2140_v0  ;;  %1737 = vmatpush3.bf16.msra.mxu0 %v1960_v18  ;;  %v1991_v18 = vld [vmem:[#allocation4 + $0xb8] sm:$0xff]  }
  0x6c   :  { %1738 = vmatprep.subr.bf16.mxu0 %v2140_v0 }
  0x6f   :  { %1739 = vmatpush3.bf16.msra.mxu0 %v1961_v19  ;;  %v1992_v19 = vld [vmem:[#allocation6 + $0x80] sm:$0xff]  }
  0x70   :  { %1740 = vmatprep.subr.bf16.mxu0 %v2140_v0 }
  0x73   :  { %1741 = vmatpush3.bf16.msra.mxu0 %v1962_v20  ;;  %v1993_v20 = vld [vmem:[#allocation6 + $0x88] sm:$0xff]  }
  0x74   :  { %1742 = vmatprep.subr.bf16.mxu0 %v2140_v0 }
  0x77   :  { %1743 = vmatpush3.bf16.msra.mxu0 %v1963_v21  ;;  %v1994_v21 = vld [vmem:[#allocation6 + $0x90] sm:$0xff]  }
  0x78   :  { %1744 = vmatprep.subr.bf16.mxu0 %v2140_v0 }
  0x7b   :  { %1745 = vmatpush3.bf16.msra.mxu0 %v1964_v22  ;;  %v1995_v22 = vld [vmem:[#allocation6 + $0x98] sm:$0xff]  }
  0x7c   :  { %1746 = vmatprep.subr.bf16.mxu0 %v2140_v0 }
  0x7f   :  { %1747 = vmatpush3.bf16.msra.mxu0 %v1965_v23  ;;  %v1996_v23 = vld [vmem:[#allocation6 + $0xa0] sm:$0xff]  }
  0x80   :  { %1748 = vmatprep.subr.bf16.mxu0 %v2140_v0 }
  0x83   :  { %1749 = vmatpush3.bf16.msra.mxu0 %v1966_v31 }
  0x84   :  { %1750 = vmatprep.subr.bf16.mxu0 %v2140_v0 }
  0x87   :  { %1751 = vmatpush3.bf16.msra.mxu0 %v1967_v32 }
  0x88   :  { %1776 = vmatprep.subr.bf16.mxu0 %v2140_v0 }
 0x13d   :  { %v194_v25 = vpop.f32.mrb[0].mxu0 }
 0x13e   :  { %v2302_v26 = vadd.f32 %v1472_v24, %v194_v25  ;;  %v1714_v27 = vpop.f32.mrb[1].mxu0  ;;  %v1997_v24 = vld [vmem:[#allocation6 + $0xa8] sm:$0xff]   ;;  %v1510_v25 = vld [vmem:[%s2454_s6 + $0x1] ss:$0 sm:$0xff] }
 0x13f   :  { %v197_v28 = vpop.f32.mrb[2].mxu0 }
 0x140   :  { %v200_v29 = vpack.c.bf16 %v2302_v26, %v2302_v26  ;;  %v1715_v30 = vpop.f32.mrb[3].mxu0 }
 0x142   :  { %1733 = vmatmul.mubr.bf16.vlgmr.msra.gmra.mrb[0].mxu1 %v200_v29 }
 0x143   :  { %1772 = vmatprep.mubr.msk.bf16.mxu1 %vm2141_vm0, %v2140_v0  ;;  %1757 = vmatpush3.bf16.msra.mxu1 %v1968_v33 }
 0x144   :  { %1758 = vmatprep.subr.bf16.mxu1 %v2140_v0 }
 0x147   :  { %1759 = vmatpush3.bf16.msra.mxu1 %v1969_v34  ;;  %v1998_v34 = vld [vmem:[#allocation6 + $0xb0] sm:$0xff]  }
 0x148   :  { %1760 = vmatprep.subr.bf16.mxu1 %v2140_v0 }
 0x14b   :  { %1761 = vmatpush3.bf16.msra.mxu1 %v1970_v35  ;;  %v1999_v35 = vld [vmem:[#allocation6 + $0xb8] sm:$0xff]  }
 0x14c   :  { %1762 = vmatprep.subr.bf16.mxu1 %v2140_v0 }
 0x14f   :  { %1763 = vmatpush3.bf16.msra.mxu1 %v1971_v36  ;;  %v2000_v36 = vld [vmem:[#allocation4 + $0xc0] sm:$0xff]  }
 0x150   :  { %1764 = vmatprep.subr.bf16.mxu1 %v2140_v0 }
 0x153   :  { %1765 = vmatpush3.bf16.msra.mxu1 %v1972_v37  ;;  %v2001_v37 = vld [vmem:[#allocation4 + $0xc8] sm:$0xff]  }
 0x154   :  { %1766 = vmatprep.subr.bf16.mxu1 %v2140_v0 }
 0x157   :  { %1767 = vmatpush3.bf16.msra.mxu1 %v1973_v38  ;;  %v2002_v38 = vld [vmem:[#allocation4 + $0xd0] sm:$0xff]  }
 0x158   :  { %1768 = vmatprep.subr.bf16.mxu1 %v2140_v0 }
 0x15b   :  { %1769 = vmatpush3.bf16.msra.mxu1 %v1974_v47 }
 0x15c   :  { %1770 = vmatprep.subr.bf16.mxu1 %v2140_v0 }
 0x15f   :  { %1771 = vmatpush3.bf16.msra.mxu1 %v1975_v48 }
 0x160   :  { %1796 = vmatprep.subr.bf16.mxu1 %v2140_v0 }
 0x215   :  { %v306_v40 = vpop.f32.mrb[0].mxu1 }
 0x216   :  { %v307_v41 = vadd.f32 %v1481_v39, %v306_v40  ;;  %v1734_v42 = vpop.f32.mrb[1].mxu1  ;;  %v2003_v39 = vld [vmem:[#allocation4 + $0xd8] sm:$0xff]   ;;  %v2004_v40 = vld [vmem:[#allocation4 + $0xe0] sm:$0xff]  }
 0x217   :  { %v309_v43 = vpop.f32.mrb[2].mxu1  ;;  %v1520_v42 = vld [vmem:[%s2452_s4 + $0x2] ss:$0 sm:$0xff] }
 0x218   :  { %v312_v44 = vmax.f32 %v307_v41, 0.0  ;;  %v1735_v45 = vpop.f32.mrb[3].mxu1  ;;  %v2005_v41 = vld [vmem:[#allocation4 + $0xe8] sm:$0xff]  }
 0x21a   :  { %v313_v46 = vpack.c.bf16 %v312_v44, %v312_v44 }
 0x21c   :  { %1753 = vmatmul.mubr.bf16.vlgmr.msra.gmra.mrb[4].mxu0 %v313_v46 }
 0x21d   :  { %1792 = vmatprep.mubr.msk.bf16.mxu0 %vm2141_vm0, %v2140_v0  ;;  %1777 = vmatpush3.bf16.msra.mxu0 %v1976_v49 }
 0x21e   :  { %1778 = vmatprep.subr.bf16.mxu0 %v2140_v0 }
 0x221   :  { %1779 = vmatpush3.bf16.msra.mxu0 %v1977_v50  ;;  %v2006_v50 = vld [vmem:[#allocation4 + $0xf0] sm:$0xff]  }
 0x222   :  { %1780 = vmatprep.subr.bf16.mxu0 %v2140_v0 }
 0x225   :  { %1781 = vmatpush3.bf16.msra.mxu0 %v1978_v51  ;;  %v2007_v51 = vld [vmem:[#allocation4 + $0xf8] sm:$0xff]  }
 0x226   :  { %1782 = vmatprep.subr.bf16.mxu0 %v2140_v0 }
 0x229   :  { %1783 = vmatpush3.bf16.msra.mxu0 %v1979_v52  ;;  %v2008_v52 = vld [vmem:[#allocation6 + $0xc0] sm:$0xff]  }
 0x22a   :  { %1784 = vmatprep.subr.bf16.mxu0 %v2140_v0 }
 0x22d   :  { %1785 = vmatpush3.bf16.msra.mxu0 %v1980_v53  ;;  %v2009_v53 = vld [vmem:[#allocation6 + $0xc8] sm:$0xff]  }
 0x22e   :  { %1786 = vmatprep.subr.bf16.mxu0 %v2140_v0 }
 0x231   :  { %1787 = vmatpush3.bf16.msra.mxu0 %v1981_v54  ;;  %v2010_v54 = vld [vmem:[#allocation6 + $0xd0] sm:$0xff]  }
 0x232   :  { %1788 = vmatprep.subr.bf16.mxu0 %v2140_v0 }
 0x235   :  { %1789 = vmatpush3.bf16.msra.mxu0 %v1982_v1 }
 0x236   :  { %1790 = vmatprep.subr.bf16.mxu0 %v2140_v0 }
 0x239   :  { %1791 = vmatpush3.bf16.msra.mxu0 %v1983_v2 }
 0x23a   :  { %1816 = vmatprep.subr.bf16.mxu0 %v2140_v0 }
 0x2ef   :  { %v419_v56 = vpop.f32.mrb[4].mxu0 }
 0x2f0   :  { %v420_v57 = vadd.f32 %v1490_v55, %v419_v56  ;;  %v1754_v58 = vpop.f32.mrb[5].mxu0  ;;  %v2011_v55 = vld [vmem:[#allocation6 + $0xd8] sm:$0xff]   ;;  %v2012_v56 = vld [vmem:[#allocation6 + $0xe0] sm:$0xff]  }
 0x2f1   :  { %v422_v59 = vpop.f32.mrb[6].mxu0  ;;  %v1530_v58 = vld [vmem:[%s2454_s6 + $0x2] ss:$0 sm:$0xff] }
 0x2f2   :  { %v425_v60 = vadd.f32 %v420_v57, %v2302_v26  ;;  %v1755_v61 = vpop.f32.mrb[7].mxu0  ;;  %v2013_v57 = vld [vmem:[#allocation6 + $0xe8] sm:$0xff]  }
 0x2f4   :  { %v2333_v62 = vmax.f32 %v425_v60, 0.0 }
 0x2f6   :  { %v427_v63 = vpack.c.bf16 %v2333_v62, %v2333_v62 }
 0x2f8   :  { %1773 = vmatmul.mubr.bf16.vlgmr.msra.gmra.mrb[4].mxu1 %v427_v63 }
 0x2f9   :  { %1812 = vmatprep.mubr.msk.bf16.mxu1 %vm2141_vm0, %v2140_v0  ;;  %1797 = vmatpush3.bf16.msra.mxu1 %v1984_v3 }
 0x2fa   :  { %1798 = vmatprep.subr.bf16.mxu1 %v2140_v0 }
 0x2fd   :  { %1799 = vmatpush3.bf16.msra.mxu1 %v1985_v4  ;;  %v2014_v4 = vld [vmem:[#allocation6 + $0xf0] sm:$0xff]  }
 0x2fe   :  { %1800 = vmatprep.subr.bf16.mxu1 %v2140_v0 }
 0x301   :  { %1801 = vmatpush3.bf16.msra.mxu1 %v1986_v5  ;;  %v2015_v5 = vld [vmem:[#allocation6 + $0xf8] sm:$0xff]  }
 0x302   :  { %1802 = vmatprep.subr.bf16.mxu1 %v2140_v0 }
 0x305   :  { %1803 = vmatpush3.bf16.msra.mxu1 %v1987_v6  ;;  %v2016_v6 = vld [vmem:[#allocation4 + $0x100] sm:$0xff]  }
 0x306   :  { %1804 = vmatprep.subr.bf16.mxu1 %v2140_v0 }
 0x309   :  { %1805 = vmatpush3.bf16.msra.mxu1 %v1988_v7  ;;  %v2017_v7 = vld [vmem:[#allocation4 + $0x108] sm:$0xff]  }
 0x30a   :  { %1806 = vmatprep.subr.bf16.mxu1 %v2140_v0 }
 0x30d   :  { %1807 = vmatpush3.bf16.msra.mxu1 %v1989_v8  ;;  %v2018_v8 = vld [vmem:[#allocation4 + $0x110] sm:$0xff]  }
 0x30e   :  { %1808 = vmatprep.subr.bf16.mxu1 %v2140_v0 }
 0x311   :  { %1809 = vmatpush3.bf16.msra.mxu1 %v1990_v17 }
 0x312   :  { %1810 = vmatprep.subr.bf16.mxu1 %v2140_v0 }
 0x315   :  { %1811 = vmatpush3.bf16.msra.mxu1 %v1991_v18 }
 0x316   :  { %1836 = vmatprep.subr.bf16.mxu1 %v2140_v0 }
 0x3cb   :  { %v535_v10 = vpop.f32.mrb[4].mxu1 }
 0x3cc   :  { %v536_v11 = vadd.f32 %v1500_v9, %v535_v10  ;;  %v1774_v12 = vpop.f32.mrb[5].mxu1  ;;  %v2019_v9 = vld [vmem:[#allocation4 + $0x118] sm:$0xff]   ;;  %v2020_v10 = vld [vmem:[#allocation4 + $0x120] sm:$0xff]  }
 0x3cd   :  { %v538_v13 = vpop.f32.mrb[6].mxu1  ;;  %v1540_v12 = vld [vmem:[%s2452_s4 + $0x3] ss:$0 sm:$0xff] }
 0x3ce   :  { %v541_v14 = vmax.f32 %v536_v11, 0.0  ;;  %v1775_v15 = vpop.f32.mrb[7].mxu1  ;;  %v2021_v11 = vld [vmem:[#allocation4 + $0x128] sm:$0xff]  }
 0x3d0   :  { %v542_v16 = vpack.c.bf16 %v541_v14, %v541_v14 }
 0x3d2   :  { %1793 = vmatmul.mubr.bf16.vlgmr.msra.gmra.mrb[8].mxu0 %v542_v16 }
 0x3d3   :  { %1832 = vmatprep.mubr.msk.bf16.mxu0 %vm2141_vm0, %v2140_v0  ;;  %1817 = vmatpush3.bf16.msra.mxu0 %v1992_v19 }
 0x3d4   :  { %1818 = vmatprep.subr.bf16.mxu0 %v2140_v0 }
 0x3d7   :  { %1819 = vmatpush3.bf16.msra.mxu0 %v1993_v20  ;;  %v2022_v20 = vld [vmem:[#allocation4 + $0x130] sm:$0xff]  }
 0x3d8   :  { %1820 = vmatprep.subr.bf16.mxu0 %v2140_v0 }
 0x3db   :  { %1821 = vmatpush3.bf16.msra.mxu0 %v1994_v21  ;;  %v2023_v21 = vld [vmem:[#allocation4 + $0x138] sm:$0xff]  }
 0x3dc   :  { %1822 = vmatprep.subr.bf16.mxu0 %v2140_v0 }
 0x3df   :  { %1823 = vmatpush3.bf16.msra.mxu0 %v1995_v22  ;;  %v2024_v22 = vld [vmem:[#allocation6 + $0x100] sm:$0xff]  }
 0x3e0   :  { %1824 = vmatprep.subr.bf16.mxu0 %v2140_v0 }
 0x3e3   :  { %1825 = vmatpush3.bf16.msra.mxu0 %v1996_v23  ;;  %v2025_v23 = vld [vmem:[#allocation6 + $0x108] sm:$0xff]  }
 0x3e4   :  { %1826 = vmatprep.subr.bf16.mxu0 %v2140_v0 }
 0x3e7   :  { %1827 = vmatpush3.bf16.msra.mxu0 %v1997_v24  ;;  %v2026_v24 = vld [vmem:[#allocation6 + $0x110] sm:$0xff]  }
 0x3e8   :  { %1828 = vmatprep.subr.bf16.mxu0 %v2140_v0 }
 0x3eb   :  { %1829 = vmatpush3.bf16.msra.mxu0 %v1998_v34 }
 0x3ec   :  { %1830 = vmatprep.subr.bf16.mxu0 %v2140_v0 }
 0x3ef   :  { %1831 = vmatpush3.bf16.msra.mxu0 %v1999_v35 }
 0x3f0   :  { %1856 = vmatprep.subr.bf16.mxu0 %v2140_v0 }
 0x4a5   :  { %v650_v26 = vpop.f32.mrb[8].mxu0 }
 0x4a6   :  { %v651_v27 = vadd.f32 %v1510_v25, %v650_v26  ;;  %v1794_v28 = vpop.f32.mrb[9].mxu0  ;;  %v2027_v25 = vld [vmem:[#allocation6 + $0x118] sm:$0xff]   ;;  %v2028_v26 = vld [vmem:[#allocation6 + $0x120] sm:$0xff]  }
 0x4a7   :  { %v653_v29 = vpop.f32.mrb[10].mxu0  ;;  %v1550_v28 = vld [vmem:[%s2454_s6 + $0x3] ss:$0 sm:$0xff] }
 0x4a8   :  { %v656_v30 = vadd.f32 %v651_v27, %v2333_v62  ;;  %v1795_v31 = vpop.f32.mrb[11].mxu0  ;;  %v2029_v27 = vld [vmem:[#allocation6 + $0x128] sm:$0xff]  }
 0x4aa   :  { %v2364_v32 = vmax.f32 %v656_v30, 0.0 }
 0x4ac   :  { %v658_v33 = vpack.c.bf16 %v2364_v32, %v2364_v32 }
 0x4ae   :  { %1813 = vmatmul.mubr.bf16.vlgmr.msra.gmra.mrb[8].mxu1 %v658_v33 }
 0x4af   :  { %1852 = vmatprep.mubr.msk.bf16.mxu1 %vm2141_vm0, %v2140_v0  ;;  %1837 = vmatpush3.bf16.msra.mxu1 %v2000_v36 }
 0x4b0   :  { %1838 = vmatprep.subr.bf16.mxu1 %v2140_v0 }
 0x4b3   :  { %1839 = vmatpush3.bf16.msra.mxu1 %v2001_v37  ;;  %v2030_v37 = vld [vmem:[#allocation6 + $0x130] sm:$0xff]  }
 0x4b4   :  { %1840 = vmatprep.subr.bf16.mxu1 %v2140_v0 }
 0x4b7   :  { %1841 = vmatpush3.bf16.msra.mxu1 %v2002_v38  ;;  %v2031_v38 = vld [vmem:[#allocation6 + $0x138] sm:$0xff]  }
 0x4b8   :  { %1842 = vmatprep.subr.bf16.mxu1 %v2140_v0 }
 0x4bb   :  { %1843 = vmatpush3.bf16.msra.mxu1 %v2003_v39  ;;  %v2032_v39 = vld [vmem:[#allocation7] sm:$0xff]  }
 0x4bc   :  { %1844 = vmatprep.subr.bf16.mxu1 %v2140_v0 }
 0x4bf   :  { %1845 = vmatpush3.bf16.msra.mxu1 %v2004_v40  ;;  %v2033_v40 = vld [vmem:[#allocation7 + $0x8] sm:$0xff]  }
 0x4c0   :  { %1846 = vmatprep.subr.bf16.mxu1 %v2140_v0 }
 0x4c3   :  { %1847 = vmatpush3.bf16.msra.mxu1 %v2005_v41  ;;  %v2034_v41 = vld [vmem:[#allocation7 + $0x10] sm:$0xff]  }
 0x4c4   :  { %1848 = vmatprep.subr.bf16.mxu1 %v2140_v0 }
 0x4c7   :  { %1849 = vmatpush3.bf16.msra.mxu1 %v2006_v50 }
 0x4c8   :  { %1850 = vmatprep.subr.bf16.mxu1 %v2140_v0 }
 0x4cb   :  { %1851 = vmatpush3.bf16.msra.mxu1 %v2007_v51 }
 0x4cc   :  { %1876 = vmatprep.subr.bf16.mxu1 %v2140_v0 }
 0x581   :  { %v766_v43 = vpop.f32.mrb[8].mxu1 }
 0x582   :  { %v767_v44 = vadd.f32 %v1520_v42, %v766_v43  ;;  %v1814_v45 = vpop.f32.mrb[9].mxu1  ;;  %v2035_v42 = vld [vmem:[#allocation7 + $0x18] sm:$0xff]   ;;  %v2036_v43 = vld [vmem:[#allocation7 + $0x20] sm:$0xff]  }
 0x583   :  { %v769_v46 = vpop.f32.mrb[10].mxu1  ;;  %v1560_v45 = vld [vmem:[%s2452_s4 + $0x4] ss:$0 sm:$0xff] }
 0x584   :  { %v772_v47 = vmax.f32 %v767_v44, 0.0  ;;  %v1815_v48 = vpop.f32.mrb[11].mxu1  ;;  %v2037_v44 = vld [vmem:[#allocation7 + $0x28] sm:$0xff]  }
 0x586   :  { %v773_v49 = vpack.c.bf16 %v772_v47, %v772_v47 }
 0x588   :  { %1833 = vmatmul.mubr.bf16.vlgmr.msra.gmra.mrb[12].mxu0 %v773_v49 }
 0x589   :  { %1872 = vmatprep.mubr.msk.bf16.mxu0 %vm2141_vm0, %v2140_v0  ;;  %1857 = vmatpush3.bf16.msra.mxu0 %v2008_v52 }
 0x58a   :  { %1858 = vmatprep.subr.bf16.mxu0 %v2140_v0 }
 0x58d   :  { %1859 = vmatpush3.bf16.msra.mxu0 %v2009_v53  ;;  %v2038_v53 = vld [vmem:[#allocation7 + $0x30] sm:$0xff]  }
 0x58e   :  { %1860 = vmatprep.subr.bf16.mxu0 %v2140_v0 }
 0x591   :  { %1861 = vmatpush3.bf16.msra.mxu0 %v2010_v54  ;;  %v2039_v54 = vld [vmem:[#allocation7 + $0x38] sm:$0xff]  }
 0x592   :  { %1862 = vmatprep.subr.bf16.mxu0 %v2140_v0 }
 0x595   :  { %1863 = vmatpush3.bf16.msra.mxu0 %v2011_v55  ;;  %v1570_v55 = vld [vmem:[%s2454_s6 + $0x4] ss:$0 sm:$0xff] }
 0x596   :  { %1864 = vmatprep.subr.bf16.mxu0 %v2140_v0 }
 0x599   :  { %1865 = vmatpush3.bf16.msra.mxu0 %v2012_v56 }
 0x59a   :  { %1866 = vmatprep.subr.bf16.mxu0 %v2140_v0 }
 0x59d   :  { %1867 = vmatpush3.bf16.msra.mxu0 %v2013_v57 }
 0x59e   :  { %1868 = vmatprep.subr.bf16.mxu0 %v2140_v0 }
 0x5a1   :  { %1869 = vmatpush3.bf16.msra.mxu0 %v2014_v4 }
 0x5a2   :  { %1870 = vmatprep.subr.bf16.mxu0 %v2140_v0 }
 0x5a5   :  { %1871 = vmatpush3.bf16.msra.mxu0 %v2015_v5 }
 0x5a6   :  { %1896 = vmatprep.subr.bf16.mxu0 %v2140_v0 }
 0x65b   :  { %v881_v59 = vpop.f32.mrb[12].mxu0 }
 0x65c   :  { %v882_v60 = vadd.f32 %v1530_v58, %v881_v59  ;;  %v1834_v61 = vpop.f32.mrb[13].mxu0 }
 0x65d   :  { %v884_v62 = vpop.f32.mrb[14].mxu0 }
 0x65e   :  { %v887_v63 = vadd.f32 %v882_v60, %v2364_v32  ;;  %v1835_v1 = vpop.f32.mrb[15].mxu0 }
 0x65f   :  { %v1579_v1 = vld [vmem:[%s2456_s8] ss:$0 sm:$0xff] }
 0x660   :  { %v2395_v2 = vmax.f32 %v887_v63, 0.0 }
 0x662   :  { %v889_v3 = vpack.c.bf16 %v2395_v2, %v2395_v2 }
 0x664   :  { %1853 = vmatmul.mubr.bf16.vlgmr.msra.gmra.mrb[12].mxu1 %v889_v3 }
 0x665   :  { %1892 = vmatprep.mubr.msk.bf16.mxu1 %vm2141_vm0, %v2140_v0  ;;  %1877 = vmatpush3.bf16.msra.mxu1 %v2016_v6 }
 0x666   :  { %1878 = vmatprep.subr.bf16.mxu1 %v2140_v0 }
 0x669   :  { %1879 = vmatpush3.bf16.msra.mxu1 %v2017_v7 }
 0x66a   :  { %1880 = vmatprep.subr.bf16.mxu1 %v2140_v0 }
 0x66d   :  { %1881 = vmatpush3.bf16.msra.mxu1 %v2018_v8 }
 0x66e   :  { %1882 = vmatprep.subr.bf16.mxu1 %v2140_v0 }
 0x671   :  { %1883 = vmatpush3.bf16.msra.mxu1 %v2019_v9 }
 0x672   :  { %1884 = vmatprep.subr.bf16.mxu1 %v2140_v0 }
 0x675   :  { %1885 = vmatpush3.bf16.msra.mxu1 %v2020_v10 }
 0x676   :  { %1886 = vmatprep.subr.bf16.mxu1 %v2140_v0 }
 0x679   :  { %1887 = vmatpush3.bf16.msra.mxu1 %v2021_v11 }
 0x67a   :  { %1888 = vmatprep.subr.bf16.mxu1 %v2140_v0 }
 0x67d   :  { %1889 = vmatpush3.bf16.msra.mxu1 %v2022_v20 }
 0x67e   :  { %1890 = vmatprep.subr.bf16.mxu1 %v2140_v0 }
 0x681   :  { %1891 = vmatpush3.bf16.msra.mxu1 %v2023_v21 }
 0x682   :  { %1916 = vmatprep.subr.bf16.mxu1 %v2140_v0 }
 0x737   :  { %v997_v13 = vpop.f32.mrb[12].mxu1 }
 0x738   :  { %v998_v14 = vadd.f32 %v1540_v12, %v997_v13  ;;  %v1854_v15 = vpop.f32.mrb[13].mxu1 }
 0x739   :  { %v1000_v16 = vpop.f32.mrb[14].mxu1 }
 0x73a   :  { %v1003_v17 = vmax.f32 %v998_v14, 0.0  ;;  %v1855_v18 = vpop.f32.mrb[15].mxu1 }
 0x73c   :  { %v1004_v19 = vpack.c.bf16 %v1003_v17, %v1003_v17 }
 0x73e   :  { %1873 = vmatmul.mubr.bf16.vlgmr.msra.gmra.mrb[16].mxu0 %v1004_v19 }
 0x73f   :  { %1912 = vmatprep.mubr.msk.bf16.mxu0 %vm2141_vm0, %v2140_v0  ;;  %1897 = vmatpush3.bf16.msra.mxu0 %v2024_v22 }
 0x740   :  { %1898 = vmatprep.subr.bf16.mxu0 %v2140_v0 }
 0x743   :  { %1899 = vmatpush3.bf16.msra.mxu0 %v2025_v23 }
 0x744   :  { %1900 = vmatprep.subr.bf16.mxu0 %v2140_v0 }
 0x747   :  { %1901 = vmatpush3.bf16.msra.mxu0 %v2026_v24 }
 0x748   :  { %1902 = vmatprep.subr.bf16.mxu0 %v2140_v0 }
 0x74b   :  { %1903 = vmatpush3.bf16.msra.mxu0 %v2027_v25 }
 0x74c   :  { %1904 = vmatprep.subr.bf16.mxu0 %v2140_v0 }
 0x74f   :  { %1905 = vmatpush3.bf16.msra.mxu0 %v2028_v26 }
 0x750   :  { %1906 = vmatprep.subr.bf16.mxu0 %v2140_v0 }
 0x753   :  { %1907 = vmatpush3.bf16.msra.mxu0 %v2029_v27 }
 0x754   :  { %1908 = vmatprep.subr.bf16.mxu0 %v2140_v0 }
 0x757   :  { %1909 = vmatpush3.bf16.msra.mxu0 %v2030_v37 }
 0x758   :  { %1910 = vmatprep.subr.bf16.mxu0 %v2140_v0 }
 0x75b   :  { %1911 = vmatpush3.bf16.msra.mxu0 %v2031_v38 }
 0x811   :  { %v1112_v29 = vpop.f32.mrb[16].mxu0 }
 0x812   :  { %v1113_v30 = vadd.f32 %v1550_v28, %v1112_v29  ;;  %v1874_v31 = vpop.f32.mrb[17].mxu0 }
 0x813   :  { %v1115_v32 = vpop.f32.mrb[18].mxu0 }
 0x814   :  { %v1118_v33 = vadd.f32 %v1113_v30, %v2395_v2  ;;  %v1875_v34 = vpop.f32.mrb[19].mxu0 }
 0x816   :  { %v1119_v35 = vmax.f32 %v1118_v33, 0.0 }
 0x818   :  { %v1120_v36 = vpack.c.bf16 %v1119_v35, %v1119_v35 }
 0x81a   :  { %1893 = vmatmul.mubr.bf16.vlgmr.msra.gmra.mrb[16].mxu1 %v1120_v36 }
 0x81b   :  { %1932 = vmatprep.mubr.msk.bf16.mxu1 %vm2141_vm0, %v2140_v0  ;;  %1917 = vmatpush3.bf16.msra.mxu1 %v2032_v39 }
 0x81c   :  { %1918 = vmatprep.subr.bf16.mxu1 %v2140_v0 }
 0x81f   :  { %1919 = vmatpush3.bf16.msra.mxu1 %v2033_v40 }
 0x820   :  { %1920 = vmatprep.subr.bf16.mxu1 %v2140_v0 }
 0x823   :  { %1921 = vmatpush3.bf16.msra.mxu1 %v2034_v41 }
 0x824   :  { %1922 = vmatprep.subr.bf16.mxu1 %v2140_v0 }
 0x827   :  { %1923 = vmatpush3.bf16.msra.mxu1 %v2035_v42 }
 0x828   :  { %1924 = vmatprep.subr.bf16.mxu1 %v2140_v0 }
 0x82b   :  { %1925 = vmatpush3.bf16.msra.mxu1 %v2036_v43 }
 0x82c   :  { %1926 = vmatprep.subr.bf16.mxu1 %v2140_v0 }
 0x82f   :  { %1927 = vmatpush3.bf16.msra.mxu1 %v2037_v44 }
 0x830   :  { %1928 = vmatprep.subr.bf16.mxu1 %v2140_v0 }
 0x833   :  { %1929 = vmatpush3.bf16.msra.mxu1 %v2038_v53 }
 0x834   :  { %1930 = vmatprep.subr.bf16.mxu1 %v2140_v0 }
 0x837   :  { %1931 = vmatpush3.bf16.msra.mxu1 %v2039_v54 }
 0x8ed   :  { %v1228_v46 = vpop.f32.mrb[16].mxu1 }
 0x8ee   :  { %v1229_v47 = vadd.f32 %v1560_v45, %v1228_v46  ;;  %v1894_v48 = vpop.f32.mrb[17].mxu1 }
 0x8ef   :  { %v1231_v49 = vpop.f32.mrb[18].mxu1 }
 0x8f0   :  { %v1234_v50 = vmax.f32 %v1229_v47, 0.0  ;;  %v1895_v51 = vpop.f32.mrb[19].mxu1 }
 0x8f2   :  { %v1235_v52 = vpack.c.bf16 %v1234_v50, %v1234_v50 }
 0x8f4   :  { %1913 = vmatmul.mubr.bf16.vlgmr.msra.gmra.mrb[20].mxu0 %v1235_v52 }
 0x9c7   :  { %v1343_v56 = vpop.f32.mrb[20].mxu0 }
 0x9c8   :  { %v1344_v57 = vadd.f32 %v1570_v55, %v1343_v56  ;;  %v1914_v58 = vpop.f32.mrb[21].mxu0 }
 0x9c9   :  { %v1346_v59 = vpop.f32.mrb[22].mxu0 }
 0x9ca   :  { %v1349_v60 = vadd.f32 %v1344_v57, %v1119_v35  ;;  %v1915_v61 = vpop.f32.mrb[23].mxu0 }
 0x9cc   :  { %v1350_v62 = vmax.f32 %v1349_v60, 0.0 }
 0x9ce   :  { %v1351_v63 = vpack.c.bf16 %v1350_v62, %v1350_v62 }
 0x9d0   :  { %1933 = vmatmul.mubr.bf16.vlgmr.msra.gmra.mrb[20].mxu1 %v1351_v63 }
 0xaa3   :  { %v1457_v0 = vpop.f32.mrb[20].mxu1 }
 0xaa4   :  { %v1458_v2 = vadd.f32 %v1579_v1, %v1457_v0  ;;  %v1934_v3 = vpop.f32.mrb[21].mxu1 }
 0xaa5   :  { %v1460_v4 = vpop.f32.mrb[22].mxu1 }
 0xaa6   :  { %v1463_v5 = vpack.c.bf16 %v1458_v2, %v1458_v2  ;;  %v1935_v6 = vpop.f32.mrb[23].mxu1 }
 0xaa8   :  { %1464 = vst [vmem:[%s2457_s9] sm:$0xf] %v1463_v5 }
 0xaa9   :  { %1469 = vsyncpa [#allocation3], 1 }
 0xaaa   :  { %1470 = vsyncpa [#allocation5], 1 }
 0xaab   :  { %1471 = vsyncpa [#allocation8], 1 }

</bundles_post_ra>
